<compile_context>
chip_gen: v7x
topology: tpu7x:2x2x1
jax: 0.10.0
libtpu: 0.0.40
codegen_flags: <defaults>
</compile_context>

<pallas_src>
import functools

import jax
import jax.numpy as jnp
from jax.experimental import pallas as pl
from jax.experimental.pallas import tpu as pltpu


# --------------------------- small helpers -------------------------------- #
def _round_up(x, m):
    return ((x + m - 1) // m) * m


def _pick_tiles(n):
    """Pad N only to a multiple of 128; pick the largest tile in
    {1024,512,256,128} that divides n_pad.  Cap the row tile so there are at
    least two row blocks (keeps v7x's second TensorCore busy)."""
    n_pad = _round_up(max(n, 1), 128)

    def largest_divisor(cap):
        for t in (1024, 512, 256, 128):
            if t <= cap and n_pad % t == 0:
                return t
        return 128

    tk = largest_divisor(1024)
    tm = largest_divisor(1024)
    if n_pad // tm < 2:
        half = n_pad // 2
        if half >= 128 and half % 8 == 0:
            tm = half
    return n_pad, tm, tk


def _vmem_limit(working_set_bytes):
    """Derive vmem_limit_bytes from actual chip VMEM (v7x: 64 MiB physical)."""
    try:
        cap = int(pltpu.get_tpu_info().vmem_capacity_bytes)
    except Exception:  # conservative fallback (smallest generation)
        cap = 64 * 1024 * 1024
    hi = int(cap * 0.6)
    lo = 16 * 1024 * 1024
    want = int(working_set_bytes * 1.5)
    return max(lo, min(want, hi))


# ----------------------- Pallas kernel: X @ W (+cast) ---------------------- #
def _feature_transform_kernel(x_ref, w_ref, out_ref):
    out_ref[...] = jnp.dot(
        x_ref[...], w_ref[...], preferred_element_type=jnp.float32
    ).astype(out_ref.dtype)


def feature_transform(x, w, *, tm, out_dtype=jnp.bfloat16):
    """(n_pad, f_pad) @ (f_pad, fout) -> (n_pad, fout), row-tiled, W resident."""
    n_pad, f_pad = x.shape
    fout = w.shape[1]
    return pl.pallas_call(
        _feature_transform_kernel,
        out_shape=jax.ShapeDtypeStruct((n_pad, fout), out_dtype),
        grid_spec=pltpu.PrefetchScalarGridSpec(
            num_scalar_prefetch=0,
            grid=(n_pad // tm,),
            in_specs=[
                pl.BlockSpec((tm, f_pad), lambda i: (i, 0)),
                pl.BlockSpec((f_pad, fout), lambda i: (0, 0)),
            ],
            out_specs=pl.BlockSpec((tm, fout), lambda i: (i, 0)),
        ),
        compiler_params=pltpu.CompilerParams(
            dimension_semantics=("parallel",),
        ),
        cost_estimate=pl.CostEstimate(
            flops=2 * n_pad * f_pad * fout,
            transcendentals=0,
            bytes_accessed=x.size * x.dtype.itemsize
            + w.size * w.dtype.itemsize
            + n_pad * fout * jnp.dtype(out_dtype).itemsize,
        ),
    )(x, w)


# ---- Pallas kernel: layer 1 = relu(A@XW + b1), fused epilogue HW = H@W2 ---- #
def _layer1_kernel(a_ref, xw_ref, b1_ref, w2_ref, hidden_ref, hw_ref, acc_ref, *, tk):
    k = pl.program_id(1)

    @pl.when(k == 0)
    def _():
        acc_ref[...] = jnp.zeros_like(acc_ref)

    kk = pl.multiple_of(k * tk, tk)
    # XW is VMEM-resident; slice the K block in-kernel (no HBM re-fetch per row).
    acc_ref[...] += jnp.dot(
        a_ref[...], xw_ref[pl.ds(kk, tk), :], preferred_element_type=jnp.float32
    )

    @pl.when(k == pl.num_programs(1) - 1)
    def _():
        h = jnp.maximum(acc_ref[...] + b1_ref[...], 0.0)
        hidden_ref[...] = h
        # Fused layer-2 feature transform: HW = hidden_bf16 @ W2 (bf16 out).
        hw_ref[...] = jnp.dot(
            h.astype(jnp.bfloat16), w2_ref[...], preferred_element_type=jnp.float32
        ).astype(hw_ref.dtype)


def gcn_layer1(a, xw, b1, w2, *, tm, tk):
    n_pad = a.shape[0]
    h_pad = xw.shape[1]
    c_pad = w2.shape[1]
    grid = (n_pad // tm, n_pad // tk)

    working = (
        2 * tm * tk * a.dtype.itemsize            # A tiles (double-buffered)
        + 2 * n_pad * h_pad * xw.dtype.itemsize   # XW resident (conservative 2x)
        + 2 * h_pad * c_pad * w2.dtype.itemsize   # W2 resident
        + 2 * h_pad * 4                           # bias
        + 2 * tm * h_pad * 4                      # hidden out (double-buffered)
        + 2 * tm * c_pad * 2                      # hw out (double-buffered)
        + tm * h_pad * 4                          # accumulator
    )

    kernel = functools.partial(_layer1_kernel, tk=tk)
    return pl.pallas_call(
        kernel,
        out_shape=(
            jax.ShapeDtypeStruct((n_pad, h_pad), jnp.float32),
            jax.ShapeDtypeStruct((n_pad, c_pad), jnp.bfloat16),
        ),
        grid_spec=pltpu.PrefetchScalarGridSpec(
            num_scalar_prefetch=0,
            grid=grid,
            in_specs=[
                pl.BlockSpec((tm, tk), lambda i, k: (i, k)),         # A (streamed)
                pl.BlockSpec((n_pad, h_pad), lambda i, k: (0, 0)),   # XW (resident)
                pl.BlockSpec((1, h_pad), lambda i, k: (0, 0)),       # b1 (resident)
                pl.BlockSpec((h_pad, c_pad), lambda i, k: (0, 0)),   # W2 (resident)
            ],
            out_specs=[
                pl.BlockSpec((tm, h_pad), lambda i, k: (i, 0)),      # hidden (f32)
                pl.BlockSpec((tm, c_pad), lambda i, k: (i, 0)),      # HW (bf16)
            ],
            scratch_shapes=[pltpu.VMEM((tm, h_pad), jnp.float32)],
        ),
        compiler_params=pltpu.CompilerParams(
            dimension_semantics=("parallel", "arbitrary"),
            vmem_limit_bytes=_vmem_limit(working),
        ),
        cost_estimate=pl.CostEstimate(
            flops=2 * n_pad * n_pad * h_pad + 2 * n_pad * h_pad * c_pad,
            transcendentals=0,
            bytes_accessed=(
                a.size * a.dtype.itemsize
                + xw.size * xw.dtype.itemsize
                + w2.size * w2.dtype.itemsize
                + n_pad * h_pad * 4
                + n_pad * c_pad * 2
            ),
        ),
    )(a, xw, b1, w2)


# -------------- Pallas kernel: layer 2 = A @ HW + b2 (no relu) -------------- #
def _layer2_kernel(a_ref, hw_ref, b2_ref, out_ref, acc_ref, *, tk):
    k = pl.program_id(1)

    @pl.when(k == 0)
    def _():
        acc_ref[...] = jnp.zeros_like(acc_ref)

    kk = pl.multiple_of(k * tk, tk)
    acc_ref[...] += jnp.dot(
        a_ref[...], hw_ref[pl.ds(kk, tk), :], preferred_element_type=jnp.float32
    )

    @pl.when(k == pl.num_programs(1) - 1)
    def _():
        out_ref[...] = (acc_ref[...] + b2_ref[...]).astype(out_ref.dtype)


def gcn_layer2(a, hw, b2, *, tm, tk, out_dtype=jnp.float32):
    n_pad = a.shape[0]
    c_pad = hw.shape[1]
    grid = (n_pad // tm, n_pad // tk)

    working = (
        2 * tm * tk * a.dtype.itemsize            # A tiles (double-buffered)
        + 2 * n_pad * c_pad * hw.dtype.itemsize   # HW resident (conservative 2x)
        + 2 * c_pad * 4                           # bias
        + 2 * tm * c_pad * 4                      # out (double-buffered)
        + tm * c_pad * 4                          # accumulator
    )

    kernel = functools.partial(_layer2_kernel, tk=tk)
    return pl.pallas_call(
        kernel,
        out_shape=jax.ShapeDtypeStruct((n_pad, c_pad), out_dtype),
        grid_spec=pltpu.PrefetchScalarGridSpec(
            num_scalar_prefetch=0,
            grid=grid,
            in_specs=[
                pl.BlockSpec((tm, tk), lambda i, k: (i, k)),         # A (streamed)
                pl.BlockSpec((n_pad, c_pad), lambda i, k: (0, 0)),   # HW (resident)
                pl.BlockSpec((1, c_pad), lambda i, k: (0, 0)),       # b2 (resident)
            ],
            out_specs=pl.BlockSpec((tm, c_pad), lambda i, k: (i, 0)),
            scratch_shapes=[pltpu.VMEM((tm, c_pad), jnp.float32)],
        ),
        compiler_params=pltpu.CompilerParams(
            dimension_semantics=("parallel", "arbitrary"),
            vmem_limit_bytes=_vmem_limit(working),
        ),
        cost_estimate=pl.CostEstimate(
            flops=2 * n_pad * n_pad * c_pad,
            transcendentals=0,
            bytes_accessed=(
                a.size * a.dtype.itemsize
                + hw.size * hw.dtype.itemsize
                + n_pad * c_pad * jnp.dtype(out_dtype).itemsize
            ),
        ),
    )(a, hw, b2)


# ------------------------------- JAX glue ---------------------------------- #
def add_self_loops(edge_index, edge_weight, fill_value, num_nodes):
    loop_idx = jnp.arange(num_nodes, dtype=edge_index.dtype)
    loops = jnp.stack([loop_idx, loop_idx], axis=0)
    edge_index = jnp.concatenate([edge_index, loops], axis=1)
    loop_w = jnp.full((num_nodes,), fill_value, dtype=edge_weight.dtype)
    edge_weight = jnp.concatenate([edge_weight, loop_w], axis=0)
    return edge_index, edge_weight


def gcn_norm(edge_index, edge_weight, num_nodes):
    """Symmetric normalization identical to GCN.gcn_norm in the reference."""
    edge_index, edge_weight = add_self_loops(edge_index, edge_weight, 1.0, num_nodes)
    row, col = edge_index[0], edge_index[1]
    deg = jnp.zeros((num_nodes,), jnp.float32).at[col].add(edge_weight)
    deg_inv_sqrt = jnp.power(deg, -0.5)
    deg_inv_sqrt = jnp.where(jnp.isinf(deg_inv_sqrt), 0.0, deg_inv_sqrt)
    norm = deg_inv_sqrt[row] * edge_weight * deg_inv_sqrt[col]
    return edge_index, norm


def build_padded_adjacency(edge_index, norm_weight, n_pad, dtype=jnp.bfloat16):
    """A[dst, src] += norm, scattered directly into the padded buffer so the
    only extra pass over A outside the kernels is the single bf16 cast."""
    row, col = edge_index[0], edge_index[1]
    a = jnp.zeros((n_pad, n_pad), jnp.float32).at[col, row].add(norm_weight)
    return a.astype(dtype)


def surrogate_gcn_forward(x, edge_index, edge_weight, params):
    n, f = x.shape
    hidden_dim = params["w1"].shape[1]
    num_classes = params["w2"].shape[1]

    n_pad, tm, tk = _pick_tiles(n)
    f_pad = _round_up(f, 128)
    h_pad = _round_up(hidden_dim, 128)
    c_pad = _round_up(num_classes, 128)

    # Normalized adjacency, scattered straight into the padded bf16 buffer.
    ei, norm = gcn_norm(edge_index, edge_weight, n)
    a_bf16 = build_padded_adjacency(ei, norm, n_pad, dtype=jnp.bfloat16)

    x_bf16 = jnp.pad(x, ((0, n_pad - n), (0, f_pad - f))).astype(jnp.bfloat16)
    w1p = jnp.pad(params["w1"], ((0, f_pad - f), (0, h_pad - hidden_dim))).astype(jnp.bfloat16)
    b1p = jnp.pad(params["b1"], ((0, 0), (0, h_pad - hidden_dim)))
    w2p = jnp.pad(params["w2"], ((0, h_pad - hidden_dim), (0, c_pad - num_classes))).astype(jnp.bfloat16)
    b2p = jnp.pad(params["b2"], ((0, 0), (0, c_pad - num_classes)))

    # XW = X @ W1 (computed once, lane-dense bf16, kept VMEM-resident below).
    xw = feature_transform(x_bf16, w1p, tm=tm)                       # (n_pad, h_pad)

    # Layer 1 (A stream) with fused epilogue:
    #   hidden = relu(A @ XW + b1)  (f32, returned)
    #   hw     = hidden_bf16 @ W2   (bf16, feeds layer 2 directly)
    hidden_pad, hw = gcn_layer1(a_bf16, xw, b1p, w2p, tm=tm, tk=tk)

    # Dropout(0.5) in eval mode == identity.

    # Layer 2 (second A stream): out = A @ hw + b2
    out_pad = gcn_layer2(a_bf16, hw, b2p, tm=tm, tk=tk)              # (n_pad, c_pad)

    return out_pad[:n, :num_classes], hidden_pad[:n, :hidden_dim]


def reference_forward(x, edge_index, edge_weight, params):
    """Plain-JAX f32 reference for a tolerance check."""
    n = x.shape[0]
    ei, norm = gcn_norm(edge_index, edge_weight, n)
    a = build_padded_adjacency(ei, norm, n, dtype=jnp.float32)
    h = jnp.maximum(a @ (x @ params["w1"]) + params["b1"], 0.0)
    out = a @ (h @ params["w2"]) + params["b2"]
    return out, h


def init_params(key, num_features, num_classes, hidden=16):
    # Glorot-style deterministic init (GCNConv: glorot weight, zero bias).
    k1, k2 = jax.random.split(key)
    s1 = jnp.sqrt(6.0 / (num_features + hidden))
    s2 = jnp.sqrt(6.0 / (hidden + num_classes))
    return {
        "w1": jax.random.uniform(k1, (num_features, hidden), jnp.float32, -s1, s1),
        "b1": jnp.zeros((1, hidden), jnp.float32),
        "w2": jax.random.uniform(k2, (hidden, num_classes), jnp.float32, -s2, s2),
        "b2": jnp.zeros((1, num_classes), jnp.float32),
    }


if __name__ == "__main__":
    key = jax.random.PRNGKey(0)
    kx, kp = jax.random.split(key)

    num_nodes = 16
    num_features = 8
    num_classes = 4

    # Node features (N, F)
    x = jax.random.normal(kx, (num_nodes, num_features), jnp.float32)

    # Deterministic ring graph (directed both ways), shape (2, E)
    src = jnp.arange(num_nodes, dtype=jnp.int32)
    dst = (src + 1) % num_nodes
    edge_index = jnp.concatenate(
        [jnp.stack([src, dst], axis=0), jnp.stack([dst, src], axis=0)], axis=1
    )
    edge_weight = jnp.ones((edge_index.shape[1],), jnp.float32)

    params = init_params(kp, num_features, num_classes)

    fwd = jax.jit(surrogate_gcn_forward)
    out, hidden = fwd(x, edge_index, edge_weight, params)
    jax.block_until_ready((out, hidden))

    assert out.shape == (num_nodes, num_classes)
    assert hidden.shape == (num_nodes, 16)

    # Loose tolerance: kernel streams A/XW/HW in bf16 with f32 accumulation.
    out_ref, hidden_ref = reference_forward(x, edge_index, edge_weight, params)
    max_err = float(
        jnp.maximum(jnp.max(jnp.abs(out - out_ref)), jnp.max(jnp.abs(hidden - hidden_ref)))
    )
    assert max_err < 0.1, f"max abs error vs f32 reference too large: {max_err}"

    print("KERNEL_OK")
</pallas_src>

<mosaic_0001>
module attributes {stable_mosaic.version = 11 : i64} {
  func.func private @main(%arg0: i32) attributes {dimension_semantics = [#tpu.dimension_semantics<core_parallel>], iteration_bounds = array<i64: 2>, tpu.core_type = #tpu.core_type<sc_scalar_subcore>, window_params = []} {
    return
  }
}

module attributes {stable_mosaic.version = 11 : i64} {
  func.func private @main(%arg0: i32) attributes {dimension_semantics = [#tpu.dimension_semantics<core_parallel>], iteration_bounds = array<i64: 2>, tpu.core_type = #tpu.core_type<sc_scalar_subcore>, window_params = []} {
    return
  }
}

module attributes {stable_mosaic.version = 11 : i64} {
  func.func @_layer1_kernel(%arg0: i32, %arg1: i32, %arg2: memref<128x128xbf16, #tpu.memory_space<vmem>>, %arg3: memref<128x128xbf16, #tpu.memory_space<vmem>>, %arg4: memref<1x128xf32, #tpu.memory_space<vmem>>, %arg5: memref<128x128xbf16, #tpu.memory_space<vmem>>, %arg6: memref<128x128xf32, #tpu.memory_space<vmem>>, %arg7: memref<128x128xbf16, #tpu.memory_space<vmem>>, %arg8: memref<128x128xf32, #tpu.memory_space<vmem>>) attributes {dimension_semantics = [#tpu.dimension_semantics<parallel>, #tpu.dimension_semantics<arbitrary>], iteration_bounds = array<i64: 1, 1>, scalar_prefetch = 0 : i64, scratch_operands = 1 : i64, tpu.core_type = #tpu.core_type<tc>, window_params = [{transform_indices = @transform_0, window_bounds = array<i64: 128, 128>}, {pipeline_mode = #tpu.pipeline_mode<synchronous>, transform_indices = @transform_1, window_bounds = array<i64: 128, 128>}, {pipeline_mode = #tpu.pipeline_mode<synchronous>, transform_indices = @transform_2, window_bounds = array<i64: 1, 128>}, {pipeline_mode = #tpu.pipeline_mode<synchronous>, transform_indices = @transform_3, window_bounds = array<i64: 128, 128>}, {transform_indices = @transform_4, window_bounds = array<i64: 128, 128>}, {transform_indices = @transform_5, window_bounds = array<i64: 128, 128>}]} {
    %c0_i32 = arith.constant 0 : i32
    %0 = arith.cmpi eq, %arg1, %c0_i32 : i32
    %1 = arith.extui %0 : i1 to i32
    %c0_i32_0 = arith.constant 0 : i32
    %2 = arith.cmpi ne, %1, %c0_i32_0 : i32
    scf.if %2 {
      %cst_9 = arith.constant 0.000000e+00 : f32
      %15 = vector.broadcast %cst_9 : f32 to vector<128x128xf32>
      %c0_10 = arith.constant 0 : index
      %c0_11 = arith.constant 0 : index
      %16 = vector.load %arg8[%c0_10, %c0_11] : memref<128x128xf32, #tpu.memory_space<vmem>>, vector<128x128xf32>
      tpu.vector_store %arg8[%c0_10, %c0_11], %15 {strides = array<i32>} : memref<128x128xf32, #tpu.memory_space<vmem>>, vector<128x128xf32>,
    } else {
    }
    %c128_i32 = arith.constant 128 : i32
    %3 = arith.muli %arg1, %c128_i32 : i32
    %4 = tpu.assume_multiple %3, 128 : i32
    %c0 = arith.constant 0 : index
    %c0_1 = arith.constant 0 : index
    %5 = vector.load %arg8[%c0, %c0_1] : memref<128x128xf32, #tpu.memory_space<vmem>>, vector<128x128xf32>
    %c0_2 = arith.constant 0 : index
    %c0_3 = arith.constant 0 : index
    %6 = vector.load %arg2[%c0_2, %c0_3] : memref<128x128xbf16, #tpu.memory_space<vmem>>, vector<128x128xbf16>
    %7 = arith.index_cast %4 : i32 to index
    %c0_4 = arith.constant 0 : index
    %8 = vector.load %arg3[%7, %c0_4] : memref<128x128xbf16, #tpu.memory_space<vmem>>, vector<128x128xbf16>
    %cst = arith.constant dense<0.000000e+00> : vector<128x128xf32>
    %9 = tpu.matmul %6, %8, %cst {dimension_numbers = #tpu.dot_dimension_numbers<[1], [0], [0], [1], [0, 0, 1, 1], [], []>} : vector<128x128xbf16>, vector<128x128xbf16>, vector<128x128xf32> -> vector<128x128xf32>
    %10 = arith.addf %5, %9 : vector<128x128xf32>
    %c0_5 = arith.constant 0 : index
    %c0_6 = arith.constant 0 : index
    %11 = vector.load %arg8[%c0_5, %c0_6] : memref<128x128xf32, #tpu.memory_space<vmem>>, vector<128x128xf32>
    tpu.vector_store %arg8[%c0_5, %c0_6], %10 {strides = array<i32>} : memref<128x128xf32, #tpu.memory_space<vmem>>, vector<128x128xf32>,
    %c0_i32_7 = arith.constant 0 : i32
    %12 = arith.cmpi eq, %arg1, %c0_i32_7 : i32
    %13 = arith.extui %12 : i1 to i32
    %c0_i32_8 = arith.constant 0 : i32
    %14 = arith.cmpi ne, %13, %c0_i32_8 : i32
    scf.if %14 {
      %c0_9 = arith.constant 0 : index
      %c0_10 = arith.constant 0 : index
      %15 = vector.load %arg8[%c0_9, %c0_10] : memref<128x128xf32, #tpu.memory_space<vmem>>, vector<128x128xf32>
      %c0_11 = arith.constant 0 : index
      %c0_12 = arith.constant 0 : index
      %16 = vector.load %arg4[%c0_11, %c0_12] : memref<1x128xf32, #tpu.memory_space<vmem>>, vector<1x128xf32>
      %17 = vector.broadcast %16 : vector<1x128xf32> to vector<128x128xf32>
      %18 = arith.addf %15, %17 : vector<128x128xf32>
      %cst_13 = arith.constant 0.000000e+00 : f32
      %19 = vector.broadcast %cst_13 : f32 to vector<128x128xf32>
      %20 = arith.maximumf %18, %19 : vector<128x128xf32>
      %c0_14 = arith.constant 0 : index
      %c0_15 = arith.constant 0 : index
      %21 = vector.load %arg6[%c0_14, %c0_15] : memref<128x128xf32, #tpu.memory_space<vmem>>, vector<128x128xf32>
      tpu.vector_store %arg6[%c0_14, %c0_15], %20 {strides = array<i32>} : memref<128x128xf32, #tpu.memory_space<vmem>>, vector<128x128xf32>,
      %22 = arith.truncf %20 : vector<128x128xf32> to vector<128x128xbf16>
      %c0_16 = arith.constant 0 : index
      %c0_17 = arith.constant 0 : index
      %23 = vector.load %arg5[%c0_16, %c0_17] : memref<128x128xbf16, #tpu.memory_space<vmem>>, vector<128x128xbf16>
      %cst_18 = arith.constant dense<0.000000e+00> : vector<128x128xf32>
      %24 = tpu.matmul %22, %23, %cst_18 {dimension_numbers = #tpu.dot_dimension_numbers<[1], [0], [0], [1], [0, 0, 1, 1], [], []>} : vector<128x128xbf16>, vector<128x128xbf16>, vector<128x128xf32> -> vector<128x128xf32>
      %25 = arith.truncf %24 : vector<128x128xf32> to vector<128x128xbf16>
      %c0_19 = arith.constant 0 : index
      %c0_20 = arith.constant 0 : index
      %26 = vector.load %arg7[%c0_19, %c0_20] : memref<128x128xbf16, #tpu.memory_space<vmem>>, vector<128x128xbf16>
      tpu.vector_store %arg7[%c0_19, %c0_20], %25 {strides = array<i32>} : memref<128x128xbf16, #tpu.memory_space<vmem>>, vector<128x128xbf16>,
    } else {
    }
    return
  }
  func.func @transform_0(%arg0: i32, %arg1: i32) -> (i32, i32) {
    %c0_i32 = arith.constant 0 : i32
    return %arg0, %arg1 : i32, i32
  }
  func.func @transform_1(%arg0: i32, %arg1: i32) -> (i32, i32) {
    %c0_i32 = arith.constant 0 : i32
    %c0_i32_0 = arith.constant 0 : i32
    %c0_i32_1 = arith.constant 0 : i32
    return %c0_i32, %c0_i32_0 : i32, i32
  }
  func.func @transform_2(%arg0: i32, %arg1: i32) -> (i32, i32) {
    %c0_i32 = arith.constant 0 : i32
    %c0_i32_0 = arith.constant 0 : i32
    %c0_i32_1 = arith.constant 0 : i32
    return %c0_i32, %c0_i32_0 : i32, i32
  }
  func.func @transform_3(%arg0: i32, %arg1: i32) -> (i32, i32) {
    %c0_i32 = arith.constant 0 : i32
    %c0_i32_0 = arith.constant 0 : i32
    %c0_i32_1 = arith.constant 0 : i32
    return %c0_i32, %c0_i32_0 : i32, i32
  }
  func.func @transform_4(%arg0: i32, %arg1: i32) -> (i32, i32) {
    %c0_i32 = arith.constant 0 : i32
    %c0_i32_0 = arith.constant 0 : i32
    return %arg0, %c0_i32 : i32, i32
  }
  func.func @transform_5(%arg0: i32, %arg1: i32) -> (i32, i32) {
    %c0_i32 = arith.constant 0 : i32
    %c0_i32_0 = arith.constant 0 : i32
    return %arg0, %c0_i32 : i32, i32
  }
}

module attributes {stable_mosaic.version = 11 : i64} {
  func.func @_feature_transform_kernel(%arg0: i32, %arg1: memref<128x128xbf16, #tpu.memory_space<vmem>>, %arg2: memref<128x128xbf16, #tpu.memory_space<vmem>>, %arg3: memref<128x128xbf16, #tpu.memory_space<vmem>>) attributes {dimension_semantics = [#tpu.dimension_semantics<parallel>], iteration_bounds = array<i64: 1>, scalar_prefetch = 0 : i64, scratch_operands = 0 : i64, tpu.core_type = #tpu.core_type<tc>, window_params = [{transform_indices = @transform_0, window_bounds = array<i64: 128, 128>}, {pipeline_mode = #tpu.pipeline_mode<synchronous>, transform_indices = @transform_1, window_bounds = array<i64: 128, 128>}, {transform_indices = @transform_2, window_bounds = array<i64: 128, 128>}]} {
    %c0 = arith.constant 0 : index
    %c0_0 = arith.constant 0 : index
    %0 = vector.load %arg1[%c0, %c0_0] : memref<128x128xbf16, #tpu.memory_space<vmem>>, vector<128x128xbf16>
    %c0_1 = arith.constant 0 : index
    %c0_2 = arith.constant 0 : index
    %1 = vector.load %arg2[%c0_1, %c0_2] : memref<128x128xbf16, #tpu.memory_space<vmem>>, vector<128x128xbf16>
    %cst = arith.constant dense<0.000000e+00> : vector<128x128xf32>
    %2 = tpu.matmul %0, %1, %cst {dimension_numbers = #tpu.dot_dimension_numbers<[1], [0], [0], [1], [0, 0, 1, 1], [], []>} : vector<128x128xbf16>, vector<128x128xbf16>, vector<128x128xf32> -> vector<128x128xf32>
    %3 = arith.truncf %2 : vector<128x128xf32> to vector<128x128xbf16>
    %c0_3 = arith.constant 0 : index
    %c0_4 = arith.constant 0 : index
    %4 = vector.load %arg3[%c0_3, %c0_4] : memref<128x128xbf16, #tpu.memory_space<vmem>>, vector<128x128xbf16>
    tpu.vector_store %arg3[%c0_3, %c0_4], %3 {strides = array<i32>} : memref<128x128xbf16, #tpu.memory_space<vmem>>, vector<128x128xbf16>,
    return
  }
  func.func @transform_0(%arg0: i32) -> (i32, i32) {
    %c0_i32 = arith.constant 0 : i32
    %c0_i32_0 = arith.constant 0 : i32
    return %arg0, %c0_i32 : i32, i32
  }
  func.func @transform_1(%arg0: i32) -> (i32, i32) {
    %c0_i32 = arith.constant 0 : i32
    %c0_i32_0 = arith.constant 0 : i32
    %c0_i32_1 = arith.constant 0 : i32
    return %c0_i32, %c0_i32_0 : i32, i32
  }
  func.func @transform_2(%arg0: i32) -> (i32, i32) {
    %c0_i32 = arith.constant 0 : i32
    %c0_i32_0 = arith.constant 0 : i32
    return %arg0, %c0_i32 : i32, i32
  }
}

module attributes {stable_mosaic.version = 11 : i64} {
  func.func @_layer2_kernel(%arg0: i32, %arg1: i32, %arg2: memref<128x128xbf16, #tpu.memory_space<vmem>>, %arg3: memref<128x128xbf16, #tpu.memory_space<vmem>>, %arg4: memref<1x128xf32, #tpu.memory_space<vmem>>, %arg5: memref<128x128xf32, #tpu.memory_space<vmem>>, %arg6: memref<128x128xf32, #tpu.memory_space<vmem>>) attributes {dimension_semantics = [#tpu.dimension_semantics<parallel>, #tpu.dimension_semantics<arbitrary>], iteration_bounds = array<i64: 1, 1>, scalar_prefetch = 0 : i64, scratch_operands = 1 : i64, tpu.core_type = #tpu.core_type<tc>, window_params = [{transform_indices = @transform_0, window_bounds = array<i64: 128, 128>}, {pipeline_mode = #tpu.pipeline_mode<synchronous>, transform_indices = @transform_1, window_bounds = array<i64: 128, 128>}, {pipeline_mode = #tpu.pipeline_mode<synchronous>, transform_indices = @transform_2, window_bounds = array<i64: 1, 128>}, {transform_indices = @transform_3, window_bounds = array<i64: 128, 128>}]} {
    %c0_i32 = arith.constant 0 : i32
    %0 = arith.cmpi eq, %arg1, %c0_i32 : i32
    %1 = arith.extui %0 : i1 to i32
    %c0_i32_0 = arith.constant 0 : i32
    %2 = arith.cmpi ne, %1, %c0_i32_0 : i32
    scf.if %2 {
      %cst_9 = arith.constant 0.000000e+00 : f32
      %15 = vector.broadcast %cst_9 : f32 to vector<128x128xf32>
      %c0_10 = arith.constant 0 : index
      %c0_11 = arith.constant 0 : index
      %16 = vector.load %arg6[%c0_10, %c0_11] : memref<128x128xf32, #tpu.memory_space<vmem>>, vector<128x128xf32>
      tpu.vector_store %arg6[%c0_10, %c0_11], %15 {strides = array<i32>} : memref<128x128xf32, #tpu.memory_space<vmem>>, vector<128x128xf32>,
    } else {
    }
    %c128_i32 = arith.constant 128 : i32
    %3 = arith.muli %arg1, %c128_i32 : i32
    %4 = tpu.assume_multiple %3, 128 : i32
    %c0 = arith.constant 0 : index
    %c0_1 = arith.constant 0 : index
    %5 = vector.load %arg6[%c0, %c0_1] : memref<128x128xf32, #tpu.memory_space<vmem>>, vector<128x128xf32>
    %c0_2 = arith.constant 0 : index
    %c0_3 = arith.constant 0 : index
    %6 = vector.load %arg2[%c0_2, %c0_3] : memref<128x128xbf16, #tpu.memory_space<vmem>>, vector<128x128xbf16>
    %7 = arith.index_cast %4 : i32 to index
    %c0_4 = arith.constant 0 : index
    %8 = vector.load %arg3[%7, %c0_4] : memref<128x128xbf16, #tpu.memory_space<vmem>>, vector<128x128xbf16>
    %cst = arith.constant dense<0.000000e+00> : vector<128x128xf32>
    %9 = tpu.matmul %6, %8, %cst {dimension_numbers = #tpu.dot_dimension_numbers<[1], [0], [0], [1], [0, 0, 1, 1], [], []>} : vector<128x128xbf16>, vector<128x128xbf16>, vector<128x128xf32> -> vector<128x128xf32>
    %10 = arith.addf %5, %9 : vector<128x128xf32>
    %c0_5 = arith.constant 0 : index
    %c0_6 = arith.constant 0 : index
    %11 = vector.load %arg6[%c0_5, %c0_6] : memref<128x128xf32, #tpu.memory_space<vmem>>, vector<128x128xf32>
    tpu.vector_store %arg6[%c0_5, %c0_6], %10 {strides = array<i32>} : memref<128x128xf32, #tpu.memory_space<vmem>>, vector<128x128xf32>,
    %c0_i32_7 = arith.constant 0 : i32
    %12 = arith.cmpi eq, %arg1, %c0_i32_7 : i32
    %13 = arith.extui %12 : i1 to i32
    %c0_i32_8 = arith.constant 0 : i32
    %14 = arith.cmpi ne, %13, %c0_i32_8 : i32
    scf.if %14 {
      %c0_9 = arith.constant 0 : index
      %c0_10 = arith.constant 0 : index
      %15 = vector.load %arg6[%c0_9, %c0_10] : memref<128x128xf32, #tpu.memory_space<vmem>>, vector<128x128xf32>
      %c0_11 = arith.constant 0 : index
      %c0_12 = arith.constant 0 : index
      %16 = vector.load %arg4[%c0_11, %c0_12] : memref<1x128xf32, #tpu.memory_space<vmem>>, vector<1x128xf32>
      %17 = vector.broadcast %16 : vector<1x128xf32> to vector<128x128xf32>
      %18 = arith.addf %15, %17 : vector<128x128xf32>
      %c0_13 = arith.constant 0 : index
      %c0_14 = arith.constant 0 : index
      %19 = vector.load %arg5[%c0_13, %c0_14] : memref<128x128xf32, #tpu.memory_space<vmem>>, vector<128x128xf32>
      tpu.vector_store %arg5[%c0_13, %c0_14], %18 {strides = array<i32>} : memref<128x128xf32, #tpu.memory_space<vmem>>, vector<128x128xf32>,
    } else {
    }
    return
  }
  func.func @transform_0(%arg0: i32, %arg1: i32) -> (i32, i32) {
    %c0_i32 = arith.constant 0 : i32
    return %arg0, %arg1 : i32, i32
  }
  func.func @transform_1(%arg0: i32, %arg1: i32) -> (i32, i32) {
    %c0_i32 = arith.constant 0 : i32
    %c0_i32_0 = arith.constant 0 : i32
    %c0_i32_1 = arith.constant 0 : i32
    return %c0_i32, %c0_i32_0 : i32, i32
  }
  func.func @transform_2(%arg0: i32, %arg1: i32) -> (i32, i32) {
    %c0_i32 = arith.constant 0 : i32
    %c0_i32_0 = arith.constant 0 : i32
    %c0_i32_1 = arith.constant 0 : i32
    return %c0_i32, %c0_i32_0 : i32, i32
  }
  func.func @transform_3(%arg0: i32, %arg1: i32) -> (i32, i32) {
    %c0_i32 = arith.constant 0 : i32
    %c0_i32_0 = arith.constant 0 : i32
    return %arg0, %c0_i32 : i32, i32
  }
}

</mosaic_0001>

<bundles_post_ra>
// kernel: surrogate_gcn_forward.3
= control target key start
LH: loop header
LB: loop body
LE: loop exit
PB: predicated region body
PF: predicated region fallthrough
CT: control target
= control target key end

     0   :  { %s583_s1 = inlined_call_operand.vmem [shape: bf16[128,128], index: 1, kind: input, shape index: {}]   ;;  %s584_s0 = inlined_call_operand.vmem [shape: bf16[128,128], index: 0, kind: input, shape index: {}]   ;;  %s585_s2 = inlined_call_operand.vmem [shape: bf16[128,128], index: 2, kind: output, shape index: {}]  }
   0x1   :  { %v480_v0 = vld [vmem:[%s583_s1] sm:$0xff]   ;;  %v481_v1 = vld [vmem:[%s583_s1 + $0x8] sm:$0xff]   ;;  %v482_v2 = vld [vmem:[%s583_s1 + $0x10] sm:$0xff]  }
   0x2   :  { %432 = vmatprep.subr.bf16.mxu0 %v480_v0  ;;  %464 = vmatprep.subr.bf16.mxu1 %v480_v0  ;;  %v483_v3 = vld [vmem:[%s583_s1 + $0x18] sm:$0xff]   ;;  %v488_v4 = vld [vmem:[%s584_s0] sm:$0xff]   ;;  %v485_v7 = vld [vmem:[%s583_s1 + $0x28] sm:$0xff]  }
   0x3   :  { %433 = vmatpush3.bf16.msra.mxu0 %v480_v0  ;;  %472 = vmatpush3.bf16.msra.mxu1 %v480_v0  ;;  %v489_v5 = vld [vmem:[%s584_s0 + $0x20] sm:$0xff]   ;;  %v486_v8 = vld [vmem:[%s583_s1 + $0x30] sm:$0xff]   ;;  %v487_v9 = vld [vmem:[%s583_s1 + $0x38] sm:$0xff]  }
   0x4   :  { %434 = vmatprep.subr.bf16.mxu0 %v481_v1  ;;  %465 = vmatprep.subr.bf16.mxu1 %v481_v1  ;;  %v484_v6 = vld [vmem:[%s583_s1 + $0x20] sm:$0xff]   ;;  %v490_v10 = vld [vmem:[%s584_s0 + $0x8] sm:$0xff]   ;;  %v492_v12 = vld [vmem:[%s584_s0 + $0x10] sm:$0xff]  }
   0x5   :  { %448 = vmatprep.mubr.bf16.mxu0 %v488_v4  ;;  %456 = vmatprep.mubr.bf16.mxu1 %v489_v5  ;;  %v491_v11 = vld [vmem:[%s584_s0 + $0x28] sm:$0xff]   ;;  %v493_v13 = vld [vmem:[%s584_s0 + $0x30] sm:$0xff]   ;;  %v494_v14 = vld [vmem:[%s584_s0 + $0x18] sm:$0xff]  }
   0x6   :  { %v495_v15 = vld [vmem:[%s584_s0 + $0x38] sm:$0xff]  }
   0x7   :  { %435 = vmatpush3.bf16.msra.mxu0 %v481_v1  ;;  %473 = vmatpush3.bf16.msra.mxu1 %v481_v1 }
   0x8   :  { %436 = vmatprep.subr.bf16.mxu0 %v482_v2  ;;  %466 = vmatprep.subr.bf16.mxu1 %v482_v2 }
   0xb   :  { %437 = vmatpush3.bf16.msra.mxu0 %v482_v2  ;;  %474 = vmatpush3.bf16.msra.mxu1 %v482_v2 }
   0xc   :  { %438 = vmatprep.subr.bf16.mxu0 %v483_v3  ;;  %467 = vmatprep.subr.bf16.mxu1 %v483_v3 }
   0xf   :  { %439 = vmatpush3.bf16.msra.mxu0 %v483_v3  ;;  %475 = vmatpush3.bf16.msra.mxu1 %v483_v3 }
  0x10   :  { %440 = vmatprep.subr.bf16.mxu0 %v484_v6  ;;  %468 = vmatprep.subr.bf16.mxu1 %v484_v6 }
  0x13   :  { %441 = vmatpush3.bf16.msra.mxu0 %v484_v6  ;;  %476 = vmatpush3.bf16.msra.mxu1 %v484_v6 }
  0x14   :  { %442 = vmatprep.subr.bf16.mxu0 %v485_v7  ;;  %469 = vmatprep.subr.bf16.mxu1 %v485_v7 }
  0x17   :  { %443 = vmatpush3.bf16.msra.mxu0 %v485_v7  ;;  %477 = vmatpush3.bf16.msra.mxu1 %v485_v7 }
  0x18   :  { %444 = vmatprep.subr.bf16.mxu0 %v486_v8  ;;  %470 = vmatprep.subr.bf16.mxu1 %v486_v8 }
  0x1b   :  { %445 = vmatpush3.bf16.msra.mxu0 %v486_v8  ;;  %478 = vmatpush3.bf16.msra.mxu1 %v486_v8 }
  0x1c   :  { %446 = vmatprep.subr.bf16.mxu0 %v487_v9  ;;  %471 = vmatprep.subr.bf16.mxu1 %v487_v9 }
  0x1f   :  { %447 = vmatpush3.bf16.msra.mxu0 %v487_v9  ;;  %479 = vmatpush3.bf16.msra.mxu1 %v487_v9 }
  0x22   :  { %449 = vmatmul.mubr.bf16.vlgmr.msra.gmra.mrb[0].mxu0 %v490_v10  ;;  %457 = vmatmul.mubr.bf16.vlgmr.msra.gmra.mrb[0].mxu1 %v491_v11 }
  0x23   :  { %452 = vmatprep.mubr.bf16.mxu0 %v492_v12  ;;  %460 = vmatprep.mubr.bf16.mxu1 %v493_v13 }
  0x2a   :  { %453 = vmatmul.mubr.bf16.gmra.mrb[4].mxu0 %v494_v14  ;;  %461 = vmatmul.mubr.bf16.gmra.mrb[4].mxu1 %v495_v15 }
  0xf5   :  { %v450_v16 = vpop.f32.mrb[0].mxu0  ;;  %v458_v17 = vpop.f32.mrb[0].mxu1 }
  0xf6   :  { %v174_v18 = vpop.f32.mrb[1].mxu0  ;;  %v206_v19 = vpop.f32.mrb[1].mxu1 }
  0xf7   :  { %v451_v20 = vpop.f32.mrb[2].mxu0  ;;  %v459_v21 = vpop.f32.mrb[2].mxu1 }
  0xf8   :  { %v377_v22 = vpack.c.bf16 %v451_v20, %v450_v16  ;;  %v397_v23 = vpack.c.bf16 %v459_v21, %v458_v17  ;;  %v177_v24 = vpop.f32.mrb[3].mxu0  ;;  %v209_v25 = vpop.f32.mrb[3].mxu1 }
  0xf9   :  { %v372_v26 = vpack.c.bf16 %v177_v24, %v174_v18  ;;  %v392_v27 = vpack.c.bf16 %v209_v25, %v206_v19 }
  0xfa   :  { %409 = vst [vmem:[%s585_s2 + $0x8] sm:$0xff] %v377_v22   ;;  %413 = vst [vmem:[%s585_s2 + $0x28] sm:$0xff] %v397_v23  }
  0xfb   :  { %373 = vst [vmem:[%s585_s2] sm:$0xff] %v372_v26   ;;  %412 = vst [vmem:[%s585_s2 + $0x20] sm:$0xff] %v392_v27  }
  0xfd   :  { %v454_v28 = vpop.f32.mrb[4].mxu0  ;;  %v462_v29 = vpop.f32.mrb[4].mxu1 }
  0xfe   :  { %v190_v30 = vpop.f32.mrb[5].mxu0  ;;  %v222_v31 = vpop.f32.mrb[5].mxu1 }
  0xff   :  { %v455_v32 = vpop.f32.mrb[6].mxu0  ;;  %v463_v33 = vpop.f32.mrb[6].mxu1 }
 0x100   :  { %v387_v34 = vpack.c.bf16 %v455_v32, %v454_v28  ;;  %v407_v35 = vpack.c.bf16 %v463_v33, %v462_v29  ;;  %v193_v36 = vpop.f32.mrb[7].mxu0  ;;  %v225_v37 = vpop.f32.mrb[7].mxu1 }
 0x101   :  { %v382_v38 = vpack.c.bf16 %v193_v36, %v190_v30  ;;  %v402_v39 = vpack.c.bf16 %v225_v37, %v222_v31 }
 0x102   :  { %411 = vst [vmem:[%s585_s2 + $0x18] sm:$0xff] %v387_v34   ;;  %415 = vst [vmem:[%s585_s2 + $0x38] sm:$0xff] %v407_v35  }
 0x103   :  { %410 = vst [vmem:[%s585_s2 + $0x10] sm:$0xff] %v382_v38   ;;  %414 = vst [vmem:[%s585_s2 + $0x30] sm:$0xff] %v402_v39  }

// kernel: surrogate_gcn_forward.4
= control target key start
LH: loop header
LB: loop body
LE: loop exit
PB: predicated region body
PF: predicated region fallthrough
CT: control target
= control target key end

     0   :  { %s1070_s1 = inlined_call_operand.vmem [shape: bf16[128,128], index: 1, kind: input, shape index: {}]   ;;  %s1071_s0 = inlined_call_operand.vmem [shape: bf16[128,128], index: 0, kind: input, shape index: {}]   ;;  %s1072_s3 = inlined_call_operand.vmem [shape: bf16[128,128], index: 3, kind: input, shape index: {}]   ;;  %s1073_s2 = inlined_call_operand.vmem [shape: f32[1,128], index: 2, kind: input, shape index: {}]   ;;  %s1074_s4 = inlined_call_operand.vmem [shape: f32[128,128], index: 4, kind: output, shape index: {0}]   ;;  %s1075_s5 = inlined_call_operand.vmem [shape: bf16[128,128], index: 5, kind: output, shape index: {1}]  }
   0x1   :  { %v851_v0 = vld [vmem:[%s1070_s1] sm:$0xff]   ;;  %v852_v1 = vld [vmem:[%s1070_s1 + $0x8] sm:$0xff]   ;;  %v853_v2 = vld [vmem:[%s1070_s1 + $0x10] sm:$0xff]  }
   0x2   :  { %787 = vmatprep.subr.bf16.mxu0 %v851_v0  ;;  %v854_v3 = vld [vmem:[%s1070_s1 + $0x18] sm:$0xff]   ;;  %v859_v4 = vld [vmem:[%s1071_s0] sm:$0xff]   ;;  %v856_v6 = vld [vmem:[%s1070_s1 + $0x28] sm:$0xff]  }
   0x3   :  { %788 = vmatpush3.bf16.msra.mxu0 %v851_v0  ;;  %803 = vmatprep.mubr.bf16.mxu0 %v859_v4  ;;  %v855_v5 = vld [vmem:[%s1070_s1 + $0x20] sm:$0xff]   ;;  %v868_v8 = vld [vmem:[%s1072_s3 + $0x8] sm:$0xff]   ;;  %v857_v9 = vld [vmem:[%s1070_s1 + $0x30] sm:$0xff]  }
   0x4   :  { %789 = vmatprep.subr.bf16.mxu0 %v852_v1  ;;  %v867_v7 = vld [vmem:[%s1072_s3] sm:$0xff]   ;;  %v869_v10 = vld [vmem:[%s1072_s3 + $0x10] sm:$0xff]   ;;  %v858_v11 = vld [vmem:[%s1070_s1 + $0x38] sm:$0xff]  }
   0x5   :  { %819 = vmatprep.subr.bf16.mxu1 %v867_v7  ;;  %v870_v12 = vld [vmem:[%s1072_s3 + $0x18] sm:$0xff]   ;;  %v871_v13 = vld [vmem:[%s1072_s3 + $0x20] sm:$0xff]   ;;  %v860_v14 = vld [vmem:[%s1071_s0 + $0x8] sm:$0xff]  }
   0x6   :  { %820 = vmatpush3.bf16.msra.mxu1 %v867_v7  ;;  %v861_v15 = vld [vmem:[%s1071_s0 + $0x10] sm:$0xff]   ;;  %v872_v16 = vld [vmem:[%s1072_s3 + $0x28] sm:$0xff]   ;;  %v862_v17 = vld [vmem:[%s1071_s0 + $0x18] sm:$0xff]  }
   0x7   :  { %790 = vmatpush3.bf16.msra.mxu0 %v852_v1  ;;  %821 = vmatprep.subr.bf16.mxu1 %v868_v8  ;;  %v863_v18 = vld [vmem:[%s1071_s0 + $0x20] sm:$0xff]   ;;  %v864_v19 = vld [vmem:[%s1071_s0 + $0x28] sm:$0xff]   ;;  %v865_v20 = vld [vmem:[%s1071_s0 + $0x30] sm:$0xff]  }
   0x8   :  { %791 = vmatprep.subr.bf16.mxu0 %v853_v2  ;;  %v866_v21 = vld [vmem:[%s1071_s0 + $0x38] sm:$0xff]   ;;  %v873_v22 = vld [vmem:[%s1072_s3 + $0x30] sm:$0xff]   ;;  %v980_v24 = vld [vmem:[%s1073_s2] ss:$0 sm:$0xff] }
   0x9   :  { %v874_v23 = vld [vmem:[%s1072_s3 + $0x38] sm:$0xff]  }
   0xa   :  { %822 = vmatpush3.bf16.msra.mxu1 %v868_v8 }
   0xb   :  { %792 = vmatpush3.bf16.msra.mxu0 %v853_v2  ;;  %823 = vmatprep.subr.bf16.mxu1 %v869_v10 }
   0xc   :  { %793 = vmatprep.subr.bf16.mxu0 %v854_v3 }
   0xe   :  { %824 = vmatpush3.bf16.msra.mxu1 %v869_v10 }
   0xf   :  { %794 = vmatpush3.bf16.msra.mxu0 %v854_v3  ;;  %825 = vmatprep.subr.bf16.mxu1 %v870_v12 }
  0x10   :  { %795 = vmatprep.subr.bf16.mxu0 %v855_v5 }
  0x12   :  { %826 = vmatpush3.bf16.msra.mxu1 %v870_v12 }
  0x13   :  { %796 = vmatpush3.bf16.msra.mxu0 %v855_v5  ;;  %827 = vmatprep.subr.bf16.mxu1 %v871_v13 }
  0x14   :  { %797 = vmatprep.subr.bf16.mxu0 %v856_v6 }
  0x16   :  { %828 = vmatpush3.bf16.msra.mxu1 %v871_v13 }
  0x17   :  { %798 = vmatpush3.bf16.msra.mxu0 %v856_v6  ;;  %829 = vmatprep.subr.bf16.mxu1 %v872_v16 }
  0x18   :  { %799 = vmatprep.subr.bf16.mxu0 %v857_v9 }
  0x1a   :  { %830 = vmatpush3.bf16.msra.mxu1 %v872_v16 }
  0x1b   :  { %800 = vmatpush3.bf16.msra.mxu0 %v857_v9  ;;  %831 = vmatprep.subr.bf16.mxu1 %v873_v22 }
  0x1c   :  { %801 = vmatprep.subr.bf16.mxu0 %v858_v11 }
  0x1e   :  { %832 = vmatpush3.bf16.msra.mxu1 %v873_v22 }
  0x1f   :  { %802 = vmatpush3.bf16.msra.mxu0 %v858_v11  ;;  %833 = vmatprep.subr.bf16.mxu1 %v874_v23 }
  0x22   :  { %804 = vmatmul.mubr.bf16.vlgmr.msra.gmra.mrb[0].mxu0 %v860_v14  ;;  %834 = vmatpush3.bf16.msra.mxu1 %v874_v23 }
  0x23   :  { %807 = vmatprep.mubr.bf16.mxu0 %v861_v15 }
  0x2a   :  { %808 = vmatmul.mubr.bf16.gmra.mrb[4].mxu0 %v862_v17 }
  0x2b   :  { %811 = vmatprep.mubr.bf16.mxu0 %v863_v18 }
  0x32   :  { %812 = vmatmul.mubr.bf16.gmra.mrb[8].mxu0 %v864_v19 }
  0x33   :  { %815 = vmatprep.mubr.bf16.mxu0 %v865_v20 }
  0x3a   :  { %816 = vmatmul.mubr.bf16.gmra.mrb[12].mxu0 %v866_v21 }
  0xf5   :  { %v805_v25 = vpop.f32.mrb[0].mxu0 }
  0xf6   :  { %v346_v26 = vadd.f32 %v805_v25, %v980_v24  ;;  %v223_v27 = vpop.f32.mrb[1].mxu0 }
  0xf7   :  { %v344_v28 = vadd.f32 %v980_v24, %v223_v27  ;;  %v806_v29 = vpop.f32.mrb[2].mxu0 }
  0xf8   :  { %v362_v30 = vmax.f32 %v346_v26, 0.0  ;;  %v347_v31 = vadd.f32 %v806_v29, %v980_v24  ;;  %v226_v32 = vpop.f32.mrb[3].mxu0 }
  0xf9   :  { %v360_v33 = vmax.f32 %v344_v28, 0.0  ;;  %v345_v34 = vadd.f32 %v980_v24, %v226_v32 }
  0xfa   :  { %378 = vst [vmem:[%s1074_s4 + $0x10] sm:$0xff] %v362_v30  ;;  %v363_v35 = vmax.f32 %v347_v31, 0.0 }
  0xfb   :  { %376 = vst [vmem:[%s1074_s4] sm:$0xff] %v360_v33  ;;  %v361_v36 = vmax.f32 %v345_v34, 0.0 }
  0xfc   :  { %379 = vst [vmem:[%s1074_s4 + $0x18] sm:$0xff] %v363_v35  ;;  %v393_v37 = vpack.c.bf16 %v363_v35, %v362_v30 }
  0xfd   :  { %377 = vst [vmem:[%s1074_s4 + $0x8] sm:$0xff] %v361_v36  ;;  %v809_v38 = vpop.f32.mrb[4].mxu0  ;;  %v392_v39 = vpack.c.bf16 %v361_v36, %v360_v33 }
  0xfe   :  { %v350_v40 = vadd.f32 %v809_v38, %v980_v24  ;;  %v239_v41 = vpop.f32.mrb[5].mxu0 }
  0xff   :  { %v348_v42 = vadd.f32 %v980_v24, %v239_v41  ;;  %v810_v43 = vpop.f32.mrb[6].mxu0  ;;  %835 = vmatprep.mubr.bf16.mxu1 %v392_v39 }
 0x100   :  { %v366_v44 = vmax.f32 %v350_v40, 0.0  ;;  %v351_v45 = vadd.f32 %v810_v43, %v980_v24  ;;  %v242_v46 = vpop.f32.mrb[7].mxu0  ;;  %836 = vmatmul.mubr.bf16.vlgmr.msra.gmra.mrb[0].mxu1 %v393_v37 }
 0x101   :  { %v364_v47 = vmax.f32 %v348_v42, 0.0  ;;  %v349_v48 = vadd.f32 %v980_v24, %v242_v46 }
 0x102   :  { %382 = vst [vmem:[%s1074_s4 + $0x30] sm:$0xff] %v366_v44  ;;  %v367_v49 = vmax.f32 %v351_v45, 0.0 }
 0x103   :  { %380 = vst [vmem:[%s1074_s4 + $0x20] sm:$0xff] %v364_v47  ;;  %v365_v50 = vmax.f32 %v349_v48, 0.0 }
 0x104   :  { %383 = vst [vmem:[%s1074_s4 + $0x38] sm:$0xff] %v367_v49  ;;  %v395_v51 = vpack.c.bf16 %v367_v49, %v366_v44 }
 0x105   :  { %381 = vst [vmem:[%s1074_s4 + $0x28] sm:$0xff] %v365_v50  ;;  %v394_v52 = vpack.c.bf16 %v365_v50, %v364_v47  ;;  %v813_v53 = vpop.f32.mrb[8].mxu0 }
 0x106   :  { %v354_v54 = vadd.f32 %v813_v53, %v980_v24  ;;  %v255_v55 = vpop.f32.mrb[9].mxu0 }
 0x107   :  { %v352_v56 = vadd.f32 %v980_v24, %v255_v55  ;;  %v814_v57 = vpop.f32.mrb[10].mxu0  ;;  %839 = vmatprep.mubr.bf16.mxu1 %v394_v52 }
 0x108   :  { %v370_v58 = vmax.f32 %v354_v54, 0.0  ;;  %v355_v59 = vadd.f32 %v814_v57, %v980_v24  ;;  %v258_v60 = vpop.f32.mrb[11].mxu0  ;;  %840 = vmatmul.mubr.bf16.gmra.mrb[4].mxu1 %v395_v51 }
 0x109   :  { %v368_v61 = vmax.f32 %v352_v56, 0.0  ;;  %v353_v62 = vadd.f32 %v980_v24, %v258_v60 }
 0x10a   :  { %386 = vst [vmem:[%s1074_s4 + $0x50] sm:$0xff] %v370_v58  ;;  %v371_v63 = vmax.f32 %v355_v59, 0.0 }
 0x10b   :  { %384 = vst [vmem:[%s1074_s4 + $0x40] sm:$0xff] %v368_v61  ;;  %v369_v0 = vmax.f32 %v353_v62, 0.0 }
 0x10c   :  { %387 = vst [vmem:[%s1074_s4 + $0x58] sm:$0xff] %v371_v63  ;;  %v397_v1 = vpack.c.bf16 %v371_v63, %v370_v58 }
 0x10d   :  { %385 = vst [vmem:[%s1074_s4 + $0x48] sm:$0xff] %v369_v0  ;;  %v396_v2 = vpack.c.bf16 %v369_v0, %v368_v61  ;;  %v817_v3 = vpop.f32.mrb[12].mxu0 }
 0x10e   :  { %v358_v4 = vadd.f32 %v817_v3, %v980_v24  ;;  %v271_v5 = vpop.f32.mrb[13].mxu0 }
 0x10f   :  { %v356_v6 = vadd.f32 %v980_v24, %v271_v5  ;;  %v818_v7 = vpop.f32.mrb[14].mxu0  ;;  %843 = vmatprep.mubr.bf16.mxu1 %v396_v2 }
 0x110   :  { %v374_v8 = vmax.f32 %v358_v4, 0.0  ;;  %v359_v9 = vadd.f32 %v818_v7, %v980_v24  ;;  %v274_v10 = vpop.f32.mrb[15].mxu0  ;;  %844 = vmatmul.mubr.bf16.gmra.mrb[8].mxu1 %v397_v1 }
 0x111   :  { %v372_v11 = vmax.f32 %v356_v6, 0.0  ;;  %v357_v12 = vadd.f32 %v980_v24, %v274_v10 }
 0x112   :  { %390 = vst [vmem:[%s1074_s4 + $0x70] sm:$0xff] %v374_v8  ;;  %v375_v13 = vmax.f32 %v359_v9, 0.0 }
 0x113   :  { %388 = vst [vmem:[%s1074_s4 + $0x60] sm:$0xff] %v372_v11  ;;  %v373_v14 = vmax.f32 %v357_v12, 0.0 }
 0x114   :  { %391 = vst [vmem:[%s1074_s4 + $0x78] sm:$0xff] %v375_v13  ;;  %v399_v15 = vpack.c.bf16 %v375_v13, %v374_v8 }
 0x115   :  { %389 = vst [vmem:[%s1074_s4 + $0x68] sm:$0xff] %v373_v14  ;;  %v398_v16 = vpack.c.bf16 %v373_v14, %v372_v11 }
 0x117   :  { %847 = vmatprep.mubr.bf16.mxu1 %v398_v16 }
 0x118   :  { %848 = vmatmul.mubr.bf16.gmra.mrb[12].mxu1 %v399_v15 }
 0x1d3   :  { %v837_v17 = vpop.f32.mrb[0].mxu1 }
 0x1d4   :  { %v498_v18 = vpop.f32.mrb[1].mxu1 }
 0x1d5   :  { %v838_v19 = vpop.f32.mrb[2].mxu1 }
 0x1d6   :  { %v716_v20 = vpack.c.bf16 %v838_v19, %v837_v17  ;;  %v501_v21 = vpop.f32.mrb[3].mxu1 }
 0x1d7   :  { %v711_v22 = vpack.c.bf16 %v501_v21, %v498_v18 }
 0x1d8   :  { %748 = vst [vmem:[%s1075_s5 + $0x8] sm:$0xff] %v716_v20  }
 0x1d9   :  { %712 = vst [vmem:[%s1075_s5] sm:$0xff] %v711_v22  }
 0x1db   :  { %v841_v23 = vpop.f32.mrb[4].mxu1 }
 0x1dc   :  { %v514_v24 = vpop.f32.mrb[5].mxu1 }
 0x1dd   :  { %v842_v25 = vpop.f32.mrb[6].mxu1 }
 0x1de   :  { %v726_v26 = vpack.c.bf16 %v842_v25, %v841_v23  ;;  %v517_v27 = vpop.f32.mrb[7].mxu1 }
 0x1df   :  { %v721_v28 = vpack.c.bf16 %v517_v27, %v514_v24 }
 0x1e0   :  { %750 = vst [vmem:[%s1075_s5 + $0x18] sm:$0xff] %v726_v26  }
 0x1e1   :  { %749 = vst [vmem:[%s1075_s5 + $0x10] sm:$0xff] %v721_v28  }
 0x1e3   :  { %v845_v29 = vpop.f32.mrb[8].mxu1 }
 0x1e4   :  { %v530_v30 = vpop.f32.mrb[9].mxu1 }
 0x1e5   :  { %v846_v31 = vpop.f32.mrb[10].mxu1 }
 0x1e6   :  { %v736_v32 = vpack.c.bf16 %v846_v31, %v845_v29  ;;  %v533_v33 = vpop.f32.mrb[11].mxu1 }
 0x1e7   :  { %v731_v34 = vpack.c.bf16 %v533_v33, %v530_v30 }
 0x1e8   :  { %752 = vst [vmem:[%s1075_s5 + $0x28] sm:$0xff] %v736_v32  }
 0x1e9   :  { %751 = vst [vmem:[%s1075_s5 + $0x20] sm:$0xff] %v731_v34  }
 0x1eb   :  { %v849_v35 = vpop.f32.mrb[12].mxu1 }
 0x1ec   :  { %v546_v36 = vpop.f32.mrb[13].mxu1 }
 0x1ed   :  { %v850_v37 = vpop.f32.mrb[14].mxu1 }
 0x1ee   :  { %v746_v38 = vpack.c.bf16 %v850_v37, %v849_v35  ;;  %v549_v39 = vpop.f32.mrb[15].mxu1 }
 0x1ef   :  { %v741_v40 = vpack.c.bf16 %v549_v39, %v546_v36 }
 0x1f0   :  { %754 = vst [vmem:[%s1075_s5 + $0x38] sm:$0xff] %v746_v38  }
 0x1f1   :  { %753 = vst [vmem:[%s1075_s5 + $0x30] sm:$0xff] %v741_v40  }

// kernel: surrogate_gcn_forward.5
= control target key start
LH: loop header
LB: loop body
LE: loop exit
PB: predicated region body
PF: predicated region fallthrough
CT: control target
= control target key end

     0   :  { %s593_s1 = inlined_call_operand.vmem [shape: bf16[128,128], index: 1, kind: input, shape index: {}]   ;;  %s594_s0 = inlined_call_operand.vmem [shape: bf16[128,128], index: 0, kind: input, shape index: {}]   ;;  %s595_s2 = inlined_call_operand.vmem [shape: f32[1,128], index: 2, kind: input, shape index: {}]   ;;  %s596_s3 = inlined_call_operand.vmem [shape: f32[128,128], index: 3, kind: output, shape index: {}]  }
   0x1   :  { %v458_v0 = vld [vmem:[%s593_s1] sm:$0xff]   ;;  %v459_v1 = vld [vmem:[%s593_s1 + $0x8] sm:$0xff]   ;;  %v460_v2 = vld [vmem:[%s593_s1 + $0x10] sm:$0xff]  }
   0x2   :  { %410 = vmatprep.subr.bf16.mxu0 %v458_v0  ;;  %442 = vmatprep.subr.bf16.mxu1 %v458_v0  ;;  %v461_v3 = vld [vmem:[%s593_s1 + $0x18] sm:$0xff]   ;;  %v466_v4 = vld [vmem:[%s594_s0] sm:$0xff]   ;;  %v463_v7 = vld [vmem:[%s593_s1 + $0x28] sm:$0xff]  }
   0x3   :  { %411 = vmatpush3.bf16.msra.mxu0 %v458_v0  ;;  %450 = vmatpush3.bf16.msra.mxu1 %v458_v0  ;;  %v467_v5 = vld [vmem:[%s594_s0 + $0x20] sm:$0xff]   ;;  %v464_v8 = vld [vmem:[%s593_s1 + $0x30] sm:$0xff]   ;;  %v465_v9 = vld [vmem:[%s593_s1 + $0x38] sm:$0xff]  }
   0x4   :  { %412 = vmatprep.subr.bf16.mxu0 %v459_v1  ;;  %443 = vmatprep.subr.bf16.mxu1 %v459_v1  ;;  %v462_v6 = vld [vmem:[%s593_s1 + $0x20] sm:$0xff]   ;;  %v468_v10 = vld [vmem:[%s594_s0 + $0x8] sm:$0xff]   ;;  %v470_v12 = vld [vmem:[%s594_s0 + $0x10] sm:$0xff]  }
   0x5   :  { %426 = vmatprep.mubr.bf16.mxu0 %v466_v4  ;;  %434 = vmatprep.mubr.bf16.mxu1 %v467_v5  ;;  %v469_v11 = vld [vmem:[%s594_s0 + $0x28] sm:$0xff]   ;;  %v471_v13 = vld [vmem:[%s594_s0 + $0x30] sm:$0xff]   ;;  %v472_v14 = vld [vmem:[%s594_s0 + $0x18] sm:$0xff]  }
   0x6   :  { %v473_v15 = vld [vmem:[%s594_s0 + $0x38] sm:$0xff]   ;;  %v393_v16 = vld [vmem:[%s595_s2] ss:$0 sm:$0xff] }
   0x7   :  { %413 = vmatpush3.bf16.msra.mxu0 %v459_v1  ;;  %451 = vmatpush3.bf16.msra.mxu1 %v459_v1 }
   0x8   :  { %414 = vmatprep.subr.bf16.mxu0 %v460_v2  ;;  %444 = vmatprep.subr.bf16.mxu1 %v460_v2 }
   0xb   :  { %415 = vmatpush3.bf16.msra.mxu0 %v460_v2  ;;  %452 = vmatpush3.bf16.msra.mxu1 %v460_v2 }
   0xc   :  { %416 = vmatprep.subr.bf16.mxu0 %v461_v3  ;;  %445 = vmatprep.subr.bf16.mxu1 %v461_v3 }
   0xf   :  { %417 = vmatpush3.bf16.msra.mxu0 %v461_v3  ;;  %453 = vmatpush3.bf16.msra.mxu1 %v461_v3 }
  0x10   :  { %418 = vmatprep.subr.bf16.mxu0 %v462_v6  ;;  %446 = vmatprep.subr.bf16.mxu1 %v462_v6 }
  0x13   :  { %419 = vmatpush3.bf16.msra.mxu0 %v462_v6  ;;  %454 = vmatpush3.bf16.msra.mxu1 %v462_v6 }
  0x14   :  { %420 = vmatprep.subr.bf16.mxu0 %v463_v7  ;;  %447 = vmatprep.subr.bf16.mxu1 %v463_v7 }
  0x17   :  { %421 = vmatpush3.bf16.msra.mxu0 %v463_v7  ;;  %455 = vmatpush3.bf16.msra.mxu1 %v463_v7 }
  0x18   :  { %422 = vmatprep.subr.bf16.mxu0 %v464_v8  ;;  %448 = vmatprep.subr.bf16.mxu1 %v464_v8 }
  0x1b   :  { %423 = vmatpush3.bf16.msra.mxu0 %v464_v8  ;;  %456 = vmatpush3.bf16.msra.mxu1 %v464_v8 }
  0x1c   :  { %424 = vmatprep.subr.bf16.mxu0 %v465_v9  ;;  %449 = vmatprep.subr.bf16.mxu1 %v465_v9 }
  0x1f   :  { %425 = vmatpush3.bf16.msra.mxu0 %v465_v9  ;;  %457 = vmatpush3.bf16.msra.mxu1 %v465_v9 }
  0x22   :  { %427 = vmatmul.mubr.bf16.vlgmr.msra.gmra.mrb[0].mxu0 %v468_v10  ;;  %435 = vmatmul.mubr.bf16.vlgmr.msra.gmra.mrb[0].mxu1 %v469_v11 }
  0x23   :  { %430 = vmatprep.mubr.bf16.mxu0 %v470_v12  ;;  %438 = vmatprep.mubr.bf16.mxu1 %v471_v13 }
  0x2a   :  { %431 = vmatmul.mubr.bf16.gmra.mrb[4].mxu0 %v472_v14  ;;  %439 = vmatmul.mubr.bf16.gmra.mrb[4].mxu1 %v473_v15 }
  0xf5   :  { %v428_v17 = vpop.f32.mrb[0].mxu0  ;;  %v436_v18 = vpop.f32.mrb[0].mxu1 }
  0xf6   :  { %v341_v19 = vadd.f32 %v428_v17, %v393_v16  ;;  %v349_v20 = vadd.f32 %v436_v18, %v393_v16  ;;  %v218_v21 = vpop.f32.mrb[1].mxu0  ;;  %v250_v22 = vpop.f32.mrb[1].mxu1 }
  0xf7   :  { %v339_v23 = vadd.f32 %v393_v16, %v218_v21  ;;  %v347_v24 = vadd.f32 %v393_v16, %v250_v22  ;;  %v429_v25 = vpop.f32.mrb[2].mxu0  ;;  %v437_v26 = vpop.f32.mrb[2].mxu1 }
  0xf8   :  { %357 = vst [vmem:[%s596_s3 + $0x10] sm:$0xff] %v341_v19  ;;  %365 = vst [vmem:[%s596_s3 + $0x50] sm:$0xff] %v349_v20  ;;  %v342_v27 = vadd.f32 %v429_v25, %v393_v16  ;;  %v350_v28 = vadd.f32 %v437_v26, %v393_v16  ;;  %v221_v29 = vpop.f32.mrb[3].mxu0  ;;  %v253_v30 = vpop.f32.mrb[3].mxu1 }
  0xf9   :  { %355 = vst [vmem:[%s596_s3] sm:$0xff] %v339_v23  ;;  %363 = vst [vmem:[%s596_s3 + $0x40] sm:$0xff] %v347_v24  ;;  %v340_v31 = vadd.f32 %v393_v16, %v221_v29  ;;  %v348_v32 = vadd.f32 %v393_v16, %v253_v30 }
  0xfa   :  { %358 = vst [vmem:[%s596_s3 + $0x18] sm:$0xff] %v342_v27  ;;  %366 = vst [vmem:[%s596_s3 + $0x58] sm:$0xff] %v350_v28 }
  0xfb   :  { %356 = vst [vmem:[%s596_s3 + $0x8] sm:$0xff] %v340_v31  ;;  %364 = vst [vmem:[%s596_s3 + $0x48] sm:$0xff] %v348_v32 }
  0xfd   :  { %v432_v33 = vpop.f32.mrb[4].mxu0  ;;  %v440_v34 = vpop.f32.mrb[4].mxu1 }
  0xfe   :  { %v345_v35 = vadd.f32 %v432_v33, %v393_v16  ;;  %v353_v36 = vadd.f32 %v440_v34, %v393_v16  ;;  %v234_v37 = vpop.f32.mrb[5].mxu0  ;;  %v266_v38 = vpop.f32.mrb[5].mxu1 }
  0xff   :  { %v343_v39 = vadd.f32 %v393_v16, %v234_v37  ;;  %v351_v40 = vadd.f32 %v393_v16, %v266_v38  ;;  %v433_v41 = vpop.f32.mrb[6].mxu0  ;;  %v441_v42 = vpop.f32.mrb[6].mxu1 }
 0x100   :  { %361 = vst [vmem:[%s596_s3 + $0x30] sm:$0xff] %v345_v35  ;;  %369 = vst [vmem:[%s596_s3 + $0x70] sm:$0xff] %v353_v36  ;;  %v346_v43 = vadd.f32 %v433_v41, %v393_v16  ;;  %v354_v44 = vadd.f32 %v441_v42, %v393_v16  ;;  %v237_v45 = vpop.f32.mrb[7].mxu0  ;;  %v269_v46 = vpop.f32.mrb[7].mxu1 }
 0x101   :  { %359 = vst [vmem:[%s596_s3 + $0x20] sm:$0xff] %v343_v39  ;;  %367 = vst [vmem:[%s596_s3 + $0x60] sm:$0xff] %v351_v40  ;;  %v344_v47 = vadd.f32 %v393_v16, %v237_v45  ;;  %v352_v48 = vadd.f32 %v393_v16, %v269_v46 }
 0x102   :  { %362 = vst [vmem:[%s596_s3 + $0x38] sm:$0xff] %v346_v43  ;;  %370 = vst [vmem:[%s596_s3 + $0x78] sm:$0xff] %v354_v44 }
 0x103   :  { %360 = vst [vmem:[%s596_s3 + $0x28] sm:$0xff] %v344_v47  ;;  %368 = vst [vmem:[%s596_s3 + $0x68] sm:$0xff] %v352_v48 }

</bundles_post_ra>
